<compile_context>
chip_gen: v7x
topology: tpu7x:2x2x1
jax: 0.10.0
libtpu: 0.0.40
codegen_flags: <defaults>
</compile_context>

<pallas_src>
import functools

import jax
import jax.numpy as jnp
from jax.experimental import pallas as pl
from jax.experimental.pallas import tpu as pltpu


def se_attention_kernel(x_ref, w1t_ref, w2t_ref, o_ref, *, inv_hw):
    # x_ref:   (bt, C, HW) block of batch elements (C on sublanes, spatial on lanes)
    # w1t_ref: (C, Ch)  = fc1.weight.T
    # w2t_ref: (Ch, C)  = fc2.weight.T
    x = x_ref[...]                                           # (bt, C, HW)
    xf = x.astype(jnp.float32)

    # Squeeze: global average pool over the spatial lanes (true H*W divisor).
    pooled = jnp.sum(xf, axis=-1) * inv_hw                   # (bt, C)

    # Excitation: batched Linear -> ReLU -> Linear -> Sigmoid (no biases).
    h = jnp.dot(pooled, w1t_ref[...].astype(jnp.float32),
                preferred_element_type=jnp.float32)          # (bt, Ch)
    h = jnp.maximum(h, 0.0)
    s = jnp.dot(h, w2t_ref[...].astype(jnp.float32),
                preferred_element_type=jnp.float32)          # (bt, C)
    s = jax.nn.sigmoid(s)

    # Scale: per-(batch, channel) gate broadcast over the spatial lanes.
    o_ref[...] = (xf * s[:, :, None]).astype(o_ref.dtype)


def se_attention(x, w1, w2, *, target_block_bytes=4 << 20):
    """x: (B, C, H, W). w1: (Ch, C) fc1 weight. w2: (C, Ch) fc2 weight."""
    B, C, H, W = x.shape
    HW = H * W
    Ch = w1.shape[0]
    itemsize = jnp.dtype(x.dtype).itemsize

    # View as (B, C, H*W); no lane padding (block last-two dims == full dims).
    x_flat = x.reshape(B, C, HW)

    # --- Batch block size selection -------------------------------------
    # Big enough to amortize per-step overhead / hit HBM roofline, small
    # enough that 4x block (in + out, double-buffered) fits comfortably in
    # scoped VMEM on every generation (v7x: 64 MiB physical, 32 MiB default).
    per_elem_bytes = C * HW * itemsize
    bt_max = max(1, min(B, target_block_bytes // max(per_elem_bytes, 1)))

    num_steps = -(-B // bt_max)                       # ceil
    if B >= 2:
        num_steps = max(num_steps, 2)                 # use both TCs on v7x
        if num_steps % 2 == 1:                        # prefer an even count
            cand = num_steps + 1
            bt_c = -(-B // cand)
            if -(-B // bt_c) == cand:                 # no empty trailing block
                num_steps = cand
    bt = -(-B // num_steps)
    grid = -(-B // bt)                                # ragged last block OK

    # Scoped-VMEM budget: in + out double-buffered (4x block) + weights + slack.
    block_bytes = bt * C * HW * itemsize
    weight_bytes = (C * Ch + Ch * C) * jnp.dtype(w1.dtype).itemsize
    vmem_bytes = 4 * block_bytes + 2 * weight_bytes + (2 << 20)
    vmem_bytes = int(min(max(vmem_bytes, 8 << 20), 64 << 20))

    w1_t = w1.T            # (C, Ch)
    w2_t = w2.T            # (Ch, C)

    kernel = functools.partial(se_attention_kernel, inv_hw=1.0 / HW)

    out_flat = pl.pallas_call(
        kernel,
        out_shape=jax.ShapeDtypeStruct((B, C, HW), x.dtype),
        grid_spec=pltpu.PrefetchScalarGridSpec(
            num_scalar_prefetch=0,
            grid=(grid,),
            in_specs=[
                pl.BlockSpec((bt, C, HW), lambda b: (b, 0, 0)),
                pl.BlockSpec((C, Ch), lambda b: (0, 0)),
                pl.BlockSpec((Ch, C), lambda b: (0, 0)),
            ],
            out_specs=pl.BlockSpec((bt, C, HW), lambda b: (b, 0, 0)),
        ),
        compiler_params=pltpu.CompilerParams(
            dimension_semantics=("parallel",),
            vmem_limit_bytes=vmem_bytes),
    )(x_flat, w1_t, w2_t)

    return out_flat.reshape(B, C, H, W)


def se_attention_ref(x, w1, w2):
    """Pure-JAX reference matching the PyTorch forward."""
    xf = x.astype(jnp.float32)
    y = jnp.mean(xf, axis=(2, 3))                     # (B, C)
    y = jnp.maximum(y @ w1.T, 0.0)                    # (B, Ch)
    y = jax.nn.sigmoid(y @ w2.T)                      # (B, C)
    return (xf * y[:, :, None, None]).astype(x.dtype)


if __name__ == "__main__":
    key = jax.random.PRNGKey(0)
    kx, k1, k2, kx2 = jax.random.split(key, 4)

    # Shapes consistent with the module: channel=64, reduction=16.
    C = 64
    reduction = 16
    Ch = C // reduction
    # Deterministic init mirroring init_weights(): Linear weights ~ N(0, 0.001).
    w1 = 0.001 * jax.random.normal(k1, (Ch, C), dtype=jnp.float32)  # fc1.weight
    w2 = 0.001 * jax.random.normal(k2, (C, Ch), dtype=jnp.float32)  # fc2.weight

    jitted = jax.jit(se_attention)

    # Case 1: aligned spatial size (H*W multiple of 128), even batch.
    x1 = jax.random.normal(kx, (2, C, 16, 16), dtype=jnp.float32)
    out1 = jax.block_until_ready(jitted(x1, w1, w2))
    ref1 = se_attention_ref(x1, w1, w2)
    assert out1.shape == x1.shape
    assert jnp.allclose(out1, ref1, atol=1e-5, rtol=1e-5), "mismatch (aligned)"

    # Case 2: unaligned spatial size (H*W=225, not a multiple of 128) and a
    # ragged batch grid (B=3) — exercises the no-pad path + masked stores.
    x2 = jax.random.normal(kx2, (3, C, 15, 15), dtype=jnp.float32)
    out2 = jax.block_until_ready(jax.jit(se_attention)(x2, w1, w2))
    ref2 = se_attention_ref(x2, w1, w2)
    assert out2.shape == x2.shape
    assert jnp.allclose(out2, ref2, atol=1e-5, rtol=1e-5), "mismatch (unaligned)"

    print("KERNEL_OK")
</pallas_src>

<mosaic_0001>
module attributes {stable_mosaic.version = 11 : i64} {
  func.func @se_attention_kernel(%arg0: i32, %arg1: memref<1x64x256xf32, #tpu.memory_space<vmem>>, %arg2: memref<64x4xf32, #tpu.memory_space<vmem>>, %arg3: memref<4x64xf32, #tpu.memory_space<vmem>>, %arg4: memref<1x64x256xf32, #tpu.memory_space<vmem>>) attributes {dimension_semantics = [#tpu.dimension_semantics<parallel>], iteration_bounds = array<i64: 2>, scalar_prefetch = 0 : i64, scratch_operands = 0 : i64, tpu.core_type = #tpu.core_type<tc>, window_params = [{transform_indices = @transform_0, window_bounds = array<i64: 1, 64, 256>}, {pipeline_mode = #tpu.pipeline_mode<synchronous>, transform_indices = @transform_1, window_bounds = array<i64: 64, 4>}, {pipeline_mode = #tpu.pipeline_mode<synchronous>, transform_indices = @transform_2, window_bounds = array<i64: 4, 64>}, {transform_indices = @transform_3, window_bounds = array<i64: 1, 64, 256>}]} {
    %c0 = arith.constant 0 : index
    %c0_0 = arith.constant 0 : index
    %c0_1 = arith.constant 0 : index
    %0 = vector.load %arg1[%c0, %c0_0, %c0_1] : memref<1x64x256xf32, #tpu.memory_space<vmem>>, vector<1x64x256xf32>
    %cst = arith.constant dense<0.000000e+00> : vector<1x64xf32>
    %1 = vector.multi_reduction <add>, %0, %cst [2] : vector<1x64x256xf32> to vector<1x64xf32>
    %cst_2 = arith.constant 3.906250e-03 : f32
    %2 = vector.broadcast %cst_2 : f32 to vector<1x64xf32>
    %3 = arith.mulf %1, %2 : vector<1x64xf32>
    %c0_3 = arith.constant 0 : index
    %c0_4 = arith.constant 0 : index
    %4 = vector.load %arg2[%c0_3, %c0_4] : memref<64x4xf32, #tpu.memory_space<vmem>>, vector<64x4xf32>
    %cst_5 = arith.constant dense<0.000000e+00> : vector<1x4xf32>
    %5 = tpu.matmul %3, %4, %cst_5 {dimension_numbers = #tpu.dot_dimension_numbers<[1], [0], [0], [1], [0, 0, 1, 1], [], []>} : vector<1x64xf32>, vector<64x4xf32>, vector<1x4xf32> -> vector<1x4xf32>
    %cst_6 = arith.constant 0.000000e+00 : f32
    %6 = vector.broadcast %cst_6 : f32 to vector<1x4xf32>
    %7 = arith.maximumf %5, %6 : vector<1x4xf32>
    %c0_7 = arith.constant 0 : index
    %c0_8 = arith.constant 0 : index
    %8 = vector.load %arg3[%c0_7, %c0_8] : memref<4x64xf32, #tpu.memory_space<vmem>>, vector<4x64xf32>
    %cst_9 = arith.constant dense<0.000000e+00> : vector<1x64xf32>
    %9 = tpu.matmul %7, %8, %cst_9 {dimension_numbers = #tpu.dot_dimension_numbers<[1], [0], [0], [1], [0, 0, 1, 1], [], []>} : vector<1x4xf32>, vector<4x64xf32>, vector<1x64xf32> -> vector<1x64xf32>
    %10 = arith.negf %9 : vector<1x64xf32>
    %11 = math.exp %10 : vector<1x64xf32>
    %cst_10 = arith.constant 1.000000e+00 : f32
    %12 = vector.broadcast %cst_10 : f32 to vector<1x64xf32>
    %13 = arith.addf %12, %11 : vector<1x64xf32>
    %14 = arith.divf %12, %13 : vector<1x64xf32>
    %15 = vector.shape_cast %14 : vector<1x64xf32> to vector<1x64x1xf32>
    %16 = vector.broadcast %15 : vector<1x64x1xf32> to vector<1x64x256xf32>
    %17 = arith.mulf %0, %16 : vector<1x64x256xf32>
    %c0_11 = arith.constant 0 : index
    %c0_12 = arith.constant 0 : index
    %c0_13 = arith.constant 0 : index
    %18 = vector.load %arg4[%c0_11, %c0_12, %c0_13] : memref<1x64x256xf32, #tpu.memory_space<vmem>>, vector<1x64x256xf32>
    tpu.vector_store %arg4[%c0_11, %c0_12, %c0_13], %17 {strides = array<i32>} : memref<1x64x256xf32, #tpu.memory_space<vmem>>, vector<1x64x256xf32>,
    return
  }
  func.func @transform_0(%arg0: i32) -> (i32, i32, i32) {
    %c0_i32 = arith.constant 0 : i32
    %c0_i32_0 = arith.constant 0 : i32
    %c0_i32_1 = arith.constant 0 : i32
    return %arg0, %c0_i32, %c0_i32_0 : i32, i32, i32
  }
  func.func @transform_1(%arg0: i32) -> (i32, i32) {
    %c0_i32 = arith.constant 0 : i32
    %c0_i32_0 = arith.constant 0 : i32
    %c0_i32_1 = arith.constant 0 : i32
    return %c0_i32, %c0_i32_0 : i32, i32
  }
  func.func @transform_2(%arg0: i32) -> (i32, i32) {
    %c0_i32 = arith.constant 0 : i32
    %c0_i32_0 = arith.constant 0 : i32
    %c0_i32_1 = arith.constant 0 : i32
    return %c0_i32, %c0_i32_0 : i32, i32
  }
  func.func @transform_3(%arg0: i32) -> (i32, i32, i32) {
    %c0_i32 = arith.constant 0 : i32
    %c0_i32_0 = arith.constant 0 : i32
    %c0_i32_1 = arith.constant 0 : i32
    return %arg0, %c0_i32, %c0_i32_0 : i32, i32, i32
  }
}

</mosaic_0001>

<bundles_post_ra>
// kernel: se_attention.1
= control target key start
LH: loop header
LB: loop body
LE: loop exit
PB: predicated region body
PF: predicated region fallthrough
CT: control target
= control target key end

     0   :  { %s681_s12 = smov 0   ;;  %s826_s0 = inlined_call_operand.vmem [shape: f32[2,64,256], index: 0, kind: input, shape index: {}]   ;;  %s827_s1 = inlined_call_operand.vmem [shape: f32[64,4], index: 1, kind: input, shape index: {}]   ;;  %s828_s2 = inlined_call_operand.vmem [shape: f32[4,64], index: 2, kind: input, shape index: {}]   ;;  %s829_s3 = inlined_call_operand.vmem [shape: f32[2,64,256], index: 3, kind: output, shape index: {}]  }
   0x1 LB: > { %s571_s13 = sadd.s32 4294967295, %s656_s12   ;;  %p575_p0 = scmp.ge.s32.totalorder %s656_s12, 1  ;;  %s656_s12 = sphi %s681_s12, %s13_s12  }
   0x2   : > { %p137_p1 = scmp.lt.s32.totalorder %s656_s12, 3 }
   0x4   : > { %p138_p2 = pnand %p575_p0, %p137_p1 }
   0x5   : > { %p161_p3 = scmp.lt.s32.totalorder (!%p138_p2), %s571_s13, 1  ;;  %v219_v24 = vld [vmem:[%s827_s1] sm:$0xff] (!%p138_p2)  ;;  %v220_v25 = vld [vmem:[%s827_s1 + $0x8] sm:$0xff] (!%p138_p2)  ;;  %v658_v27 = vmov (!%p138_p2), 0.0|0.0   ;;  %v221_v28 = vld [vmem:[%s827_s1 + $0x10] sm:$0xff] (!%p138_p2)  ;;  %vm659_vm0 = vmmov (!%p138_p2), 0   ;;  %v235_v38 = vlaneseq (!%p138_p2) }
   0x6   : > { %141 = sbr.rel (%p138_p2) target bundleno = 767 (0x2ff), region = 32  ;;  %v624_v26 = vpack.c.bf16 (!%p138_p2), %v220_v25, %v219_v24  ;;  %623 = vmatprep.subr.bf16.mxu0 (!%p138_p2), %v658_v27  ;;  %v222_v29 = vld [vmem:[%s827_s1 + $0x18] sm:$0xff] (!%p138_p2)  ;;  %v223_v31 = vld [vmem:[%s827_s1 + $0x20] sm:$0xff] (!%p138_p2)  ;;  %v224_v32 = vld [vmem:[%s827_s1 + $0x28] sm:$0xff] (!%p138_p2)  ;;  %v660_v37 = vmov (!%p138_p2), 0.0   ;;  %vm246_vm1 = vcmask (!%p138_p2), 130112  }
   0x7   : > { %v627_v30 = vpack.c.bf16 (!%p138_p2), %v222_v29, %v221_v28  ;;  %v630_v33 = vpack.c.bf16 (!%p138_p2), %v224_v32, %v223_v31  ;;  %v225_v34 = vld [vmem:[%s827_s1 + $0x30] sm:$0xff] (!%p138_p2)  ;;  %v226_v35 = vld [vmem:[%s827_s1 + $0x38] sm:$0xff] (!%p138_p2)  ;;  %615 = vmatprep.mubr.msk.f32.mxu0 (!%p138_p2), %vm659_vm0, %v660_v37  ;;  %618 = vmatprep.subr.mxu1 (!%p138_p2), %v660_v37  ;;  %v236_v39 = vand.u32 (!%p138_p2), 127, %v235_v38  ;;  %v769_v40 = vshrl.u32 (!%p138_p2), %v235_v38, 7 }
   0x8   : > { %625 = vmatpush3.bf16.msra.mxu0 (!%p138_p2), %v624_v26  ;;  %v633_v36 = vpack.c.bf16 (!%p138_p2), %v226_v35, %v225_v34  ;;  %620 = vmatprep.mubr.msk.f32.mxu1 (!%p138_p2), %vm659_vm0, %v660_v37  ;;  %vm253_vm2 = vcmask (!%p138_p2), 195712   ;;  %vm260_vm3 = vcmask (!%p138_p2), 261312   ;;  %vm267_vm4 = vcmask (!%p138_p2), 326912  }
   0x9   : > { %626 = vmatprep.subr.bf16.mxu0 (!%p138_p2), %v658_v27  ;;  %v241_v41 = vadd.s32 (!%p138_p2), 4294967288, %v236_v39  ;;  %v248_v43 = vadd.s32 (!%p138_p2), 4294967280, %v236_v39  ;;  %v255_v44 = vadd.s32 (!%p138_p2), 4294967272, %v236_v39  ;;  %v239_v46 = vsub.s32 (!%p138_p2), %v236_v39, %v769_v40 }
   0xa   : > { %v262_v49 = vadd.s32 (!%p138_p2), 4294967264, %v236_v39  ;;  %v269_v54 = vadd.s32 (!%p138_p2), 4294967256, %v236_v39  ;;  %v276_v61 = vadd.s32 (!%p138_p2), 4294967248, %v236_v39  ;;  %vm274_vm5 = vcmask (!%p138_p2), 392512  }
   0xb   : > { %v244_v48 = vsub.s32 (!%p138_p2), %v241_v41, %v769_v40  ;;  %v251_v50 = vsub.s32 (!%p138_p2), %v248_v43, %v769_v40  ;;  %v258_v53 = vsub.s32 (!%p138_p2), %v255_v44, %v769_v40  ;;  %vm281_vm6 = vcmask (!%p138_p2), 458112  }
   0xc   : > { %628 = vmatpush3.bf16.msra.mxu0 (!%p138_p2), %v627_v30  ;;  %v265_v60 = vsub.s32 (!%p138_p2), %v262_v49, %v769_v40  ;;  %v279_v26 = vsub.s32 (!%p138_p2), %v276_v61, %v769_v40  ;;  %vm288_vm7 = vcmask (!%p138_p2), 523712   ;;  %vm290_vm8 = vcmask (!%p138_p2), 523264  }
   0xd   : > { %s831_s13 = smov (!%p161_p3, %s571_s13), 1  ;;  %629 = vmatprep.subr.bf16.mxu0 %v658_v27  ;;  %vm369_vm9 = vcmask 1043456   ;;  %vm365_vm10 = vcmask 31744   ;;  %v451_v49 = vsub.s32 0, %v769_v40 }
   0xe   : > { %s586_s14 = sshll.u32 %s831_s13, 7 }
   0xf   : > { %s165_s17 = scalar_lea.vmem %s826_s0, %s586_s14  ;;  %s789_s11 = scalar_lea.vmem %s829_s3, %s586_s14 }
  0x10   : > { %v697_v0 = vld [vmem:[%s165_s17] sm:$0xff]  ;;  %v699_v1 = vld [vmem:[%s165_s17 + $0x8] sm:$0xff]  ;;  %v707_v5 = vld [vmem:[%s165_s17 + $0x10] sm:$0xff]  ;;  %631 = vmatpush3.bf16.msra.mxu0 %v630_v33 }
  0x11   : > { %v701_v2 = vld [vmem:[%s165_s17 + $0x20] sm:$0xff]  ;;  %v187_v3 = vadd.f32 %v699_v1, %v697_v0  ;;  %v705_v4 = vld [vmem:[%s165_s17 + $0x28] sm:$0xff]  ;;  %v709_v6 = vld [vmem:[%s165_s17 + $0x18] sm:$0xff]  ;;  %632 = vmatprep.subr.bf16.mxu0 %v658_v27 }
  0x12   : > { %v193_v7 = vadd.f32 %v705_v4, %v701_v2  ;;  %v713_v8 = vld [vmem:[%s165_s17 + $0x30] sm:$0xff]  ;;  %v715_v9 = vld [vmem:[%s165_s17 + $0x38] sm:$0xff]  ;;  %v190_v10 = vadd.f32 %v709_v6, %v707_v5  ;;  %v721_v12 = vld [vmem:[%s165_s17 + $0x40] sm:$0xff] }
  0x13   : > { %188 = vadd.xlane.f32.xlu0 %v187_v3  ;;  %v196_v11 = vadd.f32 %v715_v9, %v713_v8  ;;  %v723_v13 = vld [vmem:[%s165_s17 + $0x48] sm:$0xff]  ;;  %v725_v14 = vld [vmem:[%s165_s17 + $0x50] sm:$0xff]  ;;  %v727_v15 = vld [vmem:[%s165_s17 + $0x58] sm:$0xff] }
  0x14   : > { %194 = vadd.xlane.f32.xlu1 %v193_v7  ;;  %v199_v16 = vadd.f32 %v723_v13, %v721_v12  ;;  %v202_v17 = vadd.f32 %v727_v15, %v725_v14  ;;  %v733_v18 = vld [vmem:[%s165_s17 + $0x60] sm:$0xff]  ;;  %v735_v19 = vld [vmem:[%s165_s17 + $0x68] sm:$0xff]  ;;  %v737_v20 = vld [vmem:[%s165_s17 + $0x70] sm:$0xff]  ;;  %634 = vmatpush3.bf16.msra.mxu0 %v633_v36  ;;  %v272_v7 = vsub.s32 %v269_v54, %v769_v40 }
  0x15   : > { %v739_v21 = vld [vmem:[%s165_s17 + $0x78] sm:$0xff]  ;;  %v205_v22 = vadd.f32 %v735_v19, %v733_v18 }
  0x16   : > { %v208_v23 = vadd.f32 %v739_v21, %v737_v20 }
  0x17   : > { %191 = vadd.xlane.f32.xlu0 %v190_v10  ;;  %v283_v10 = vadd.s32 4294967240, %v236_v39  ;;  %v364_v39 = vld [vmem:[%s828_s2] sm:$0xf] }
  0x18   : > { %197 = vadd.xlane.f32.xlu1 %v196_v11  ;;  %619 = vmatpush3.msk.msra.mxu1 %vm369_vm9, %v364_v39 }
  0x19   : > { %v286_v29 = vsub.s32 %v283_v10, %v769_v40 }
  0x1b   : > { %200 = vadd.xlane.f32.xlu0 %v199_v16 }
  0x1c   : > { %203 = vadd.xlane.f32.xlu1 %v202_v17 }
  0x1f   : > { %206 = vadd.xlane.f32.xlu0 %v205_v22 }
  0x20   : > { %209 = vadd.xlane.f32.xlu1 %v208_v23 }
  0xa0   : > { %v189_v42 = vpop.xlane.xlu0 %188 }
  0xa1   : > { %v195_v45 = vpop.xlane.xlu1 %194  ;;  %v211_v47 = vmul.f32 0.00390625, %v189_v42 }
  0xa2   : > { %v213_v51 = vmul.f32 0.00390625, %v195_v45 }
  0xa3   : > { %v240_v58 = vrot.slane %v211_v47, %v239_v46 }
  0xa4   : > { %v192_v52 = vpop.xlane.xlu0 %191  ;;  %v252_v62 = vrot.slane %v213_v51, %v251_v50 }
  0xa5   : > { %v212_v55 = vmul.f32 0.00390625, %v192_v52  ;;  %v198_v56 = vpop.xlane.xlu1 %197 }
  0xa6   : > { %v214_v57 = vmul.f32 0.00390625, %v198_v56 }
  0xa7   : > { %v245_v59 = vrot.slane %v212_v55, %v244_v48 }
  0xa8   : > { %v259_v63 = vrot.slane %v214_v57, %v258_v53  ;;  %v201_v3 = vpop.xlane.xlu0 %200 }
  0xa9   : > { %v247_v11 = vsel %vm246_vm1, %v245_v59, %v240_v58  ;;  %v215_v16 = vmul.f32 0.00390625, %v201_v3  ;;  %v204_v17 = vpop.xlane.xlu1 %203 }
  0xaa   : > { %v254_v22 = vsel %vm253_vm2, %v252_v62, %v247_v11  ;;  %v216_v23 = vmul.f32 0.00390625, %v204_v17 }
  0xab   : > { %v261_v24 = vsel %vm260_vm3, %v259_v63, %v254_v22  ;;  %v266_v25 = vrot.slane %v215_v16, %v265_v60 }
  0xac   : > { %v273_v27 = vrot.slane %v216_v23, %v272_v7  ;;  %v207_v28 = vpop.xlane.xlu0 %206 }
  0xad   : > { %v268_v30 = vsel %vm267_vm4, %v266_v25, %v261_v24  ;;  %v217_v31 = vmul.f32 0.00390625, %v207_v28  ;;  %v210_v32 = vpop.xlane.xlu1 %209 }
  0xae   : > { %v218_v33 = vmul.f32 0.00390625, %v210_v32  ;;  %v275_v35 = vsel %vm274_vm5, %v273_v27, %v268_v30 }
  0xaf   : > { %v280_v34 = vrot.slane %v217_v31, %v279_v26 }
  0xb0   : > { %v287_v36 = vrot.slane %v218_v33, %v286_v29 }
  0xb1   : > { %v282_v37 = vsel %vm281_vm6, %v280_v34, %v275_v35 }
  0xb2   : > { %v289_v38 = vsel %vm288_vm7, %v287_v36, %v282_v37 }
  0xb3   : > { %616 = vmatmul.mubr.msk.f32.vlgmr.msra.gmra.mrb[0].mxu0 %vm290_vm8, %v289_v38 }
 0x186   : > { %v359_v41 = vpop.f32.mrb[0].mxu0 }
 0x187   : > { %v363_v42 = vmax.f32 %v359_v41, 0.0  ;;  %v617_v43 = vpop.f32.mrb[1].mxu0 }
 0x189   : > { %621 = vmatmul.mubr.msk.f32.vlgmr.msra.gmra.mrb[0].mxu1 %vm365_vm10, %v363_v42 }
 0x25c   : > { %v439_v44 = vpop.f32.mrb[0].mxu1 }
 0x25d   : > { %v583_v45 = vmul.f32 -1.442695, %v439_v44  ;;  %v622_v46 = vpop.f32.mrb[1].mxu1 }
 0x25f   : > { %646 = vpow2.f32 %v583_v45 }
 0x269   : > { %v647_v47 = vpop.eup %646 }
 0x26a   : > { %v446_v48 = vadd.f32 1.0, %v647_v47 }
 0x26c   : > { %648 = vrcp.f32 %v446_v48 }
 0x276   : > { %v649_v50 = vpop.eup %648 }
 0x277   : > { %v452_v51 = vrot.slane %v649_v50, %v451_v49 }
 0x279   : > { %458 = vbcast.lane.b32.xlu1 %v452_v51, 264  ;;  %454 = vbcast.lane.b32.xlu0 %v452_v51, 256 }
 0x27d   : > { %462 = vbcast.lane.b32.xlu1 %v452_v51, 272  ;;  %470 = vbcast.lane.b32.xlu0 %v452_v51, 288 }
 0x281   : > { %466 = vbcast.lane.b32.xlu1 %v452_v51, 280  ;;  %478 = vbcast.lane.b32.xlu0 %v452_v51, 304 }
 0x285   : > { %474 = vbcast.lane.b32.xlu1 %v452_v51, 296 }
 0x289   : > { %482 = vbcast.lane.b32.xlu1 %v452_v51, 312 }
 0x2eb   : > { %v459_v40 = vpop.permute.xlu1 %458  ;;  %v455_v52 = vpop.permute.xlu0 %454 }
 0x2ec   : > { %v486_v53 = vmul.f32 %v459_v40, %v707_v5  ;;  %v487_v54 = vmul.f32 %v459_v40, %v709_v6  ;;  %v484_v55 = vmul.f32 %v455_v52, %v697_v0  ;;  %v485_v56 = vmul.f32 %v455_v52, %v699_v1 }
 0x2ee   : > { %502 = vst [vmem:[%s789_s11 + $0x10] sm:$0xff] %v486_v53  ;;  %503 = vst [vmem:[%s789_s11 + $0x18] sm:$0xff] %v487_v54 }
 0x2ef   : > { %500 = vst [vmem:[%s789_s11] sm:$0xff] %v484_v55  ;;  %501 = vst [vmem:[%s789_s11 + $0x8] sm:$0xff] %v485_v56  ;;  %v463_v57 = vpop.permute.xlu1 %462  ;;  %v471_v58 = vpop.permute.xlu0 %470 }
 0x2f0   : > { %v488_v59 = vmul.f32 %v463_v57, %v701_v2  ;;  %v489_v5 = vmul.f32 %v463_v57, %v705_v4  ;;  %v492_v6 = vmul.f32 %v471_v58, %v721_v12  ;;  %v493_v0 = vmul.f32 %v471_v58, %v723_v13 }
 0x2f2   : > { %504 = vst [vmem:[%s789_s11 + $0x20] sm:$0xff] %v488_v59  ;;  %505 = vst [vmem:[%s789_s11 + $0x28] sm:$0xff] %v489_v5 }
 0x2f3   : > { %508 = vst [vmem:[%s789_s11 + $0x40] sm:$0xff] %v492_v6  ;;  %509 = vst [vmem:[%s789_s11 + $0x48] sm:$0xff] %v493_v0  ;;  %v467_v1 = vpop.permute.xlu1 %466  ;;  %v479_v60 = vpop.permute.xlu0 %478 }
 0x2f4   : > { %v490_v61 = vmul.f32 %v467_v1, %v713_v8  ;;  %v491_v2 = vmul.f32 %v467_v1, %v715_v9  ;;  %v496_v4 = vmul.f32 %v479_v60, %v733_v18  ;;  %v497_v12 = vmul.f32 %v479_v60, %v735_v19 }
 0x2f6   : > { %506 = vst [vmem:[%s789_s11 + $0x30] sm:$0xff] %v490_v61  ;;  %507 = vst [vmem:[%s789_s11 + $0x38] sm:$0xff] %v491_v2 }
 0x2f7   : > { %512 = vst [vmem:[%s789_s11 + $0x60] sm:$0xff] %v496_v4  ;;  %513 = vst [vmem:[%s789_s11 + $0x68] sm:$0xff] %v497_v12  ;;  %v475_v13 = vpop.permute.xlu1 %474 }
 0x2f8   : > { %v494_v62 = vmul.f32 %v475_v13, %v725_v14  ;;  %v495_v63 = vmul.f32 %v475_v13, %v727_v15 }
 0x2fa   : > { %510 = vst [vmem:[%s789_s11 + $0x50] sm:$0xff] %v494_v62  ;;  %511 = vst [vmem:[%s789_s11 + $0x58] sm:$0xff] %v495_v63 }
 0x2fb   : > { %v483_v8 = vpop.permute.xlu1 %482 }
 0x2fc   : > { %v498_v3 = vmul.f32 %v483_v8, %v737_v20  ;;  %v499_v9 = vmul.f32 %v483_v8, %v739_v21 }
 0x2fe   : > { %514 = vst [vmem:[%s789_s11 + $0x70] sm:$0xff] %v498_v3  ;;  %515 = vst [vmem:[%s789_s11 + $0x78] sm:$0xff] %v499_v9 }
 0x2ff PF: > { %s13_s12 = sadd.s32 1, %s656_s12  }
 0x300   : > { %p10_p4 = scmp.ge.s32.totalorder %s13_s12, 4  }
 0x302   :  { %12 = sbr.rel (!%p10_p4) target bundleno = 1 (0x1), region = 62 }

</bundles_post_ra>
